<compile_context>
chip_gen: v5e
topology: v5e:2x2
jax: 0.10.0
libtpu: 0.0.40
codegen_flags: <defaults>
</compile_context>

<pallas_src>
import math
import jax
import jax.numpy as jnp
from jax.experimental import pallas as pl
from jax.experimental.pallas import tpu as pltpu

EPS = 1e-5
SQRT_HALF = math.sqrt(0.5)


def _ceil8(n):
    return (n + 7) // 8 * 8


# ----------------------------------------------------------------------------
# In-kernel helper: one 'same'-padded conv as a single im2col MXU matmul.
# ----------------------------------------------------------------------------
def _conv_mxu(pbuf, cbuf, x, w_ref, sh_ref, *, K, dil, pad_l, P, T):
    """x: (C_in, T) value.  w_ref: (C_out, K*C_in).  sh_ref: (C_out, 1).

    pbuf: (>=C_in, T + 2P) staging buffer whose pad columns are always zero.
    cbuf: (>=K*C_in, T) im2col staging buffer.
    Returns (C_out, T) = conv(x) + shift (bias/BN already folded in)."""
    C_in = x.shape[0]
    # Stage the activation into the (pre-zeroed) padded buffer.
    pbuf[0:C_in, P:P + T] = x
    # Gather the K shifted taps into one (K*C_in, T) operand.
    for k in range(K):
        s = P - pad_l + k * dil            # static offset
        cbuf[k * C_in:(k + 1) * C_in, 0:T] = pbuf[0:C_in, s:s + T]
    y = jnp.dot(w_ref[...], cbuf[0:K * C_in, 0:T],
                preferred_element_type=jnp.float32)
    return y + sh_ref[...]


# ----------------------------------------------------------------------------
# Weight packing: fold BN scale into weights, pad channels, im2col layout.
# ----------------------------------------------------------------------------
def _fold_scale(p):
    return p["w"] * p["scale"][:, None, None], p["shift"]


def _im2col_weight(w, c_in_pad):
    c_out, c_in, k = w.shape
    if c_in_pad > c_in:
        w = jnp.pad(w, ((0, 0), (0, c_in_pad - c_in), (0, 0)))
    # column index = k * C_in + c, matching the im2col row order in _conv_mxu
    return jnp.transpose(w, (0, 2, 1)).reshape(c_out, k * c_in_pad).astype(
        jnp.float32)


def pack_conv(p, *, c_in_pad=None, glu_pad=False, c_out_pad=None):
    w, sh = _fold_scale(p)
    c_out, c_in, k = w.shape
    if c_in_pad is None:
        c_in_pad = c_in
    if glu_pad:
        half = c_out // 2
        hp = _ceil8(half)
        w = jnp.concatenate(
            [jnp.pad(w[:half], ((0, hp - half), (0, 0), (0, 0))),
             jnp.pad(w[half:], ((0, hp - half), (0, 0), (0, 0)))], axis=0)
        sh = jnp.concatenate(
            [jnp.pad(sh[:half], (0, hp - half)),
             jnp.pad(sh[half:], (0, hp - half))], axis=0)
    elif c_out_pad is not None and c_out_pad > c_out:
        w = jnp.pad(w, ((0, c_out_pad - c_out), (0, 0), (0, 0)))
        sh = jnp.pad(sh, (0, c_out_pad - c_out))
    return dict(w=_im2col_weight(w, c_in_pad),
                sh=sh[:, None].astype(jnp.float32),
                K=k, dil=p["dilation"], pad=p["pad"])


def pack_sr(p_skip, p_res):
    """Skip + res convs of one WNCell share the same im2col operand -> pack
    them into a single (S + R, K*G) weight so they become one matmul."""
    ws, shs = _fold_scale(p_skip)
    wr, shr = _fold_scale(p_res)
    w = jnp.concatenate([ws, wr], axis=0)
    sh = jnp.concatenate([shs, shr], axis=0)
    return dict(w=_im2col_weight(w, ws.shape[1]),
                sh=sh[:, None].astype(jnp.float32),
                K=ws.shape[2], dil=1, pad=p_skip["pad"])


def pack_upsample(p):
    """Polyphase decomposition of ConvTranspose1d(k=8, s=2, p=3)."""
    w, sh = _fold_scale(p)                 # (2R, R, K) flipped conv weight
    K = w.shape[2]
    pe = p["pad"]                          # = K - 1 - conv_transpose_padding
    assert p["stride"] == 2 and K % 2 == 0 and pe % 2 == 0 and pe >= 2, (
        "polyphase rewrite assumes stride-2 ConvTranspose with even K/pad")
    w_e = w[:, :, 0::2]                    # taps for even output positions
    w_o = w[:, :, 1::2]                    # taps for odd output positions
    return dict(w_e=_im2col_weight(w_e, w_e.shape[1]),
                w_o=_im2col_weight(w_o, w_o.shape[1]),
                sh=sh[:, None].astype(jnp.float32),
                Kp=K // 2, pad_e=pe // 2, pad_o=pe // 2 - 1)


# ----------------------------------------------------------------------------
# Pallas calls
# ----------------------------------------------------------------------------
def _input_layer_call(x, pk):
    """input_layer: ConvNorm + BN + GLU, fused."""
    B, C_in, T = x.shape
    w, sh, K, dil, pad = pk["w"], pk["sh"], pk["K"], pk["dil"], pk["pad"]
    H = w.shape[0] // 2
    P = pad

    def kernel(x_ref, w_ref, s_ref, o_ref, pbuf, cbuf):
        pbuf[...] = jnp.zeros_like(pbuf)
        y = _conv_mxu(pbuf, cbuf, x_ref[0], w_ref, s_ref,
                      K=K, dil=dil, pad_l=pad, P=P, T=T)
        o_ref[0] = y[:H] * jax.nn.sigmoid(y[H:])

    return pl.pallas_call(
        kernel,
        out_shape=jax.ShapeDtypeStruct((B, H, T), jnp.float32),
        grid=(B,),
        in_specs=[pl.BlockSpec((1, C_in, T), lambda b: (b, 0, 0)),
                  pl.BlockSpec(w.shape, lambda b: (0, 0)),
                  pl.BlockSpec(sh.shape, lambda b: (0, 0))],
        out_specs=pl.BlockSpec((1, H, T), lambda b: (b, 0, 0)),
        scratch_shapes=[pltpu.VMEM((C_in, T + 2 * P), jnp.float32),
                        pltpu.VMEM((K * C_in, T), jnp.float32)],
        compiler_params=pltpu.CompilerParams(
            dimension_semantics=("parallel",)),
    )(x, w, sh)


def _upsample_call(h, pu):
    """ConvTranspose1d + BN + GLU as two polyphase K/2-tap convs (no
    zero-stuffing).  Output (B, 2, R, T): phase 0 = even, phase 1 = odd."""
    B, R, T = h.shape
    w_e, w_o, sh = pu["w_e"], pu["w_o"], pu["sh"]
    Kp, pad_e, pad_o = pu["Kp"], pu["pad_e"], pu["pad_o"]
    H = w_e.shape[0] // 2
    P = max(pad_e, Kp - 1 - pad_e, pad_o, Kp - 1 - pad_o)

    def kernel(h_ref, we_ref, wo_ref, s_ref, o_ref, pbuf, cbuf):
        pbuf[...] = jnp.zeros_like(pbuf)
        hx = h_ref[0]
        ye = _conv_mxu(pbuf, cbuf, hx, we_ref, s_ref,
                       K=Kp, dil=1, pad_l=pad_e, P=P, T=T)
        yo = _conv_mxu(pbuf, cbuf, hx, wo_ref, s_ref,
                       K=Kp, dil=1, pad_l=pad_o, P=P, T=T)
        o_ref[0, 0] = ye[:H] * jax.nn.sigmoid(ye[H:])
        o_ref[0, 1] = yo[:H] * jax.nn.sigmoid(yo[H:])

    return pl.pallas_call(
        kernel,
        out_shape=jax.ShapeDtypeStruct((B, 2, H, T), jnp.float32),
        grid=(B,),
        in_specs=[pl.BlockSpec((1, R, T), lambda b: (b, 0, 0)),
                  pl.BlockSpec(w_e.shape, lambda b: (0, 0)),
                  pl.BlockSpec(w_o.shape, lambda b: (0, 0)),
                  pl.BlockSpec(sh.shape, lambda b: (0, 0))],
        out_specs=pl.BlockSpec((1, 2, H, T), lambda b: (b, 0, 0, 0)),
        scratch_shapes=[pltpu.VMEM((R, T + 2 * P), jnp.float32),
                        pltpu.VMEM((Kp * R, T), jnp.float32)],
        compiler_params=pltpu.CompilerParams(
            dimension_semantics=("parallel",)),
    )(h, w_e, w_o, sh)


def _fused_body_call(h2, wn_packed, o1, o2, *, G, S, R):
    """All WNCells + out1(GLU) + out2 in ONE pallas_call.  The residual
    stream, gated activations and skip accumulator live in VMEM; all layer
    weights are VMEM-resident (constant index maps)."""
    B, Rh, T2 = h2.shape
    n_cells = len(wn_packed)
    Op = o1["w"].shape[0] // 2
    O2 = o2["w"].shape[0]

    weights = []
    for c in wn_packed:
        weights += [c["in_w"], c["in_sh"], c["sr_w"], c["sr_sh"]]
    weights += [o1["w"], o1["sh"], o2["w"], o2["sh"]]
    n_w = len(weights)

    P = max([c["in_pad"] for c in wn_packed]
            + [c["sr_pad"] for c in wn_packed]
            + [o1["pad"], o2["pad"]])
    c_max = max(R, G, S, Op)
    kc_max = max(w.shape[1] for w in weights[0::2])

    def kernel(*args):
        h_ref = args[0]
        wr = args[1:1 + n_w]
        o_ref = args[1 + n_w]
        pbuf = args[2 + n_w]
        cbuf = args[3 + n_w]

        pbuf[...] = jnp.zeros_like(pbuf)
        h = h_ref[0]                                 # (R, T2) residual stream
        skip = jnp.zeros((S, T2), jnp.float32)       # skip accumulator

        for ci in range(n_cells):
            c = wn_packed[ci]
            in_w, in_sh, sr_w, sr_sh = wr[4 * ci:4 * ci + 4]
            y = _conv_mxu(pbuf, cbuf, h, in_w, in_sh, K=c["K"],
                          dil=c["in_dil"], pad_l=c["in_pad"], P=P, T=T2)
            acts = jnp.tanh(y[:G]) * jax.nn.sigmoid(y[G:])
            # skip + res convs fused into one matmul:
            #   rows [0:S] = skip output, rows [S:S+R] = res output
            y2 = _conv_mxu(pbuf, cbuf, acts, sr_w, sr_sh, K=c["K"],
                           dil=1, pad_l=c["sr_pad"], P=P, T=T2)
            skip = skip + y2[:S]
            h = (h + y2[S:S + R]) * SQRT_HALF

        skip = skip * math.sqrt(1.0 / n_cells)
        o1w, o1sh, o2w, o2sh = wr[4 * n_cells:4 * n_cells + 4]
        y = _conv_mxu(pbuf, cbuf, skip, o1w, o1sh, K=o1["K"], dil=1,
                      pad_l=o1["pad"], P=P, T=T2)
        y = y[:Op] * jax.nn.sigmoid(y[Op:])          # GLU (padded rows stay 0)
        y = _conv_mxu(pbuf, cbuf, y, o2w, o2sh, K=o2["K"], dil=1,
                      pad_l=o2["pad"], P=P, T=T2)
        o_ref[0] = y

    in_specs = [pl.BlockSpec((1, Rh, T2), lambda b: (b, 0, 0))]
    for w in weights:
        in_specs.append(pl.BlockSpec(w.shape, lambda b: (0, 0)))

    return pl.pallas_call(
        kernel,
        out_shape=jax.ShapeDtypeStruct((B, O2, T2), jnp.float32),
        grid=(B,),
        in_specs=in_specs,
        out_specs=pl.BlockSpec((1, O2, T2), lambda b: (b, 0, 0)),
        scratch_shapes=[pltpu.VMEM((c_max, T2 + 2 * P), jnp.float32),
                        pltpu.VMEM((kc_max, T2), jnp.float32)],
        compiler_params=pltpu.CompilerParams(
            dimension_semantics=("parallel",)),
    )(h2, *weights)


# ----------------------------------------------------------------------------
# Full decoder forward (Pallas path)
# ----------------------------------------------------------------------------
def decoder_forward_pallas(params, x):
    B, C_in, T = x.shape
    R = params["input_layer"]["w"].shape[0] // 2
    G = params["wn"][0]["in_layer"]["w"].shape[0] // 2
    S = params["wn"][0]["skip"]["w"].shape[0]
    output_dim = params["out2"]["w"].shape[0]
    # TODO(synk): pad residual/gate/skip dims if they are not multiples of 8.
    assert R % 8 == 0 and G % 8 == 0 and S % 8 == 0

    c_in_p = _ceil8(C_in)
    if c_in_p > C_in:
        x = jnp.pad(x, ((0, 0), (0, c_in_p - C_in), (0, 0)))

    # input layer: Conv + BN + GLU
    h = _input_layer_call(x, pack_conv(params["input_layer"],
                                       c_in_pad=c_in_p, glu_pad=True))

    # upsample layers: polyphase ConvTranspose + BN + GLU, interleave phases
    for p in params["upsample"]:
        ph = _upsample_call(h, pack_upsample(p))         # (B, 2, R, Tc)
        Bc, _, Rc, Tc = ph.shape
        h = jnp.transpose(ph, (0, 2, 3, 1)).reshape(Bc, Rc, 2 * Tc)

    # fused WaveNet body + output head
    op = _ceil8(output_dim)
    wn_packed = []
    for cell in params["wn"]:
        pin = pack_conv(cell["in_layer"])
        psr = pack_sr(cell["skip"], cell["res"])
        wn_packed.append(dict(in_w=pin["w"], in_sh=pin["sh"], K=pin["K"],
                              in_dil=pin["dil"], in_pad=pin["pad"],
                              sr_w=psr["w"], sr_sh=psr["sh"],
                              sr_pad=psr["pad"]))
    o1 = pack_conv(params["out1"], glu_pad=True)
    o2 = pack_conv(params["out2"], c_in_pad=op, c_out_pad=op)
    out = _fused_body_call(h, wn_packed, o1, o2, G=G, S=S, R=R)
    return out[:, :output_dim, :]


# ----------------------------------------------------------------------------
# Pure-JAX reference (independent of the Pallas path) for validation
# ----------------------------------------------------------------------------
def conv1d_ref(x, w_oik, scale, shift, *, dilation=1, pad=0, act="none"):
    out = jax.lax.conv_general_dilated(
        x, w_oik, window_strides=(1,), padding=[(pad, pad)],
        rhs_dilation=(dilation,), dimension_numbers=("NCH", "OIH", "NCH"))
    y = out * scale[None, :, None] + shift[None, :, None]
    c = y.shape[1]
    if act == "glu":
        return y[:, :c // 2] * jax.nn.sigmoid(y[:, c // 2:])
    if act == "gate":
        return jnp.tanh(y[:, :c // 2]) * jax.nn.sigmoid(y[:, c // 2:])
    return y


def _upsample_zeros(x, stride=2):
    B, C, T = x.shape
    x_up = jnp.zeros((B, C, stride * T - (stride - 1)), x.dtype)
    return x_up.at[:, :, ::stride].set(x)


def decoder_forward_ref(params, x):
    p = params["input_layer"]
    h = conv1d_ref(x, p["w"], p["scale"], p["shift"],
                   dilation=p["dilation"], pad=p["pad"], act="glu")
    for p in params["upsample"]:
        h = conv1d_ref(_upsample_zeros(h, p["stride"]), p["w"], p["scale"],
                       p["shift"], dilation=1, pad=p["pad"], act="glu")
    skip = 0.0
    n_wn = len(params["wn"])
    for cell in params["wn"]:
        p = cell["in_layer"]
        acts = conv1d_ref(h, p["w"], p["scale"], p["shift"],
                          dilation=p["dilation"], pad=p["pad"], act="gate")
        p = cell["skip"]
        _skip = conv1d_ref(acts, p["w"], p["scale"], p["shift"],
                           dilation=1, pad=p["pad"], act="none")
        p = cell["res"]
        res = conv1d_ref(acts, p["w"], p["scale"], p["shift"],
                         dilation=1, pad=p["pad"], act="none")
        h = (h + res) * SQRT_HALF
        skip = skip + _skip
    skip = skip * math.sqrt(1.0 / n_wn)
    p = params["out1"]
    out = conv1d_ref(skip, p["w"], p["scale"], p["shift"],
                     dilation=1, pad=p["pad"], act="glu")
    p = params["out2"]
    out = conv1d_ref(out, p["w"], p["scale"], p["shift"],
                     dilation=1, pad=p["pad"], act="none")
    return out


# ----------------------------------------------------------------------------
# Parameter construction (deterministic, synthetic)
# ----------------------------------------------------------------------------
def _xavier(key, c_out, c_in, k):
    fan_in, fan_out = c_in * k, c_out * k
    bound = math.sqrt(6.0 / (fan_in + fan_out))
    return jax.random.uniform(key, (c_out, c_in, k), jnp.float32, -bound, bound)


def make_conv_bn(key, c_in, c_out, k, dilation=1, use_bn=True):
    k1, k2, k3, k4 = jax.random.split(key, 4)
    w = _xavier(k1, c_out, c_in, k)
    bias = 0.1 * jax.random.normal(k2, (c_out,), jnp.float32)
    if use_bn:
        gamma = 1.0 + 0.1 * jax.random.normal(k3, (c_out,), jnp.float32)
        beta = 0.1 * jax.random.normal(k4, (c_out,), jnp.float32)
        mean = jnp.zeros((c_out,), jnp.float32)
        var = jnp.ones((c_out,), jnp.float32)
        scale = gamma / jnp.sqrt(var + EPS)
        shift = beta - mean * scale + bias * scale
    else:
        scale = jnp.ones((c_out,), jnp.float32)
        shift = bias
    pad = (dilation * (k - 1)) // 2              # ConvNorm 'same' pad, stride 1
    return dict(w=w, scale=scale, shift=shift, dilation=dilation, pad=pad)


def make_upsample(key, c_in, k=8, stride=2, padding=3):
    """ConvTranspose1d(c_in, 2*c_in, k=8, s=2, p=3) + BN + GLU, stored as the
    equivalent regular-conv weight (flipped/transposed) with pad = k-1-p."""
    c_out = 2 * c_in
    k1, k2, k3, k4 = jax.random.split(key, 4)
    bound = 1.0 / math.sqrt(c_in * k)
    w_t = jax.random.uniform(k1, (c_in, c_out, k), jnp.float32, -bound, bound)
    w_conv = jnp.flip(jnp.transpose(w_t, (1, 0, 2)), axis=2)
    bias = 0.1 * jax.random.normal(k2, (c_out,), jnp.float32)
    gamma = 1.0 + 0.1 * jax.random.normal(k3, (c_out,), jnp.float32)
    beta = 0.1 * jax.random.normal(k4, (c_out,), jnp.float32)
    scale = gamma / jnp.sqrt(1.0 + EPS)
    shift = beta + bias * scale
    return dict(w=w_conv, scale=scale, shift=shift, dilation=1,
                pad=k - 1 - padding, stride=stride)


def make_decoder_params(key, input_dim, output_dim, residual_dim, gate_dim,
                        skip_dim, n_stage, kernel_size, dilation_rate,
                        n_upsample_factor):
    keys = jax.random.split(key, 8)
    params = {}
    params["input_layer"] = make_conv_bn(keys[0], input_dim, 2 * residual_dim,
                                         kernel_size)
    params["upsample"] = [make_upsample(jax.random.fold_in(keys[1], i),
                                        residual_dim)
                          for i in range(n_upsample_factor // 2)]
    wn = []
    idx = 0
    for _ in range(n_stage):
        for d in dilation_rate:
            kk = jax.random.fold_in(keys[2], idx)
            k_in, k_res, k_skip = jax.random.split(kk, 3)
            wn.append(dict(
                in_layer=make_conv_bn(k_in, residual_dim, 2 * gate_dim,
                                      kernel_size, dilation=d),
                res=make_conv_bn(k_res, gate_dim, residual_dim, kernel_size),
                skip=make_conv_bn(k_skip, gate_dim, skip_dim, kernel_size),
            ))
            idx += 1
    params["wn"] = wn
    params["out1"] = make_conv_bn(keys[3], skip_dim, 2 * output_dim, kernel_size)
    params["out2"] = make_conv_bn(keys[4], output_dim, output_dim, 15,
                                  use_bn=False)
    return params


# ----------------------------------------------------------------------------
if __name__ == "__main__":
    INPUT_DIM, OUTPUT_DIM = 10, 6
    RESIDUAL_DIM, GATE_DIM, SKIP_DIM = 16, 16, 32
    N_STAGE, KERNEL_SIZE = 1, 3
    DILATION_RATE = [1, 2, 4]
    N_UPSAMPLE_FACTOR = 2
    B, T = 2, 16

    root = jax.random.PRNGKey(0)
    k_params, k_x = jax.random.split(root)
    params = make_decoder_params(k_params, INPUT_DIM, OUTPUT_DIM, RESIDUAL_DIM,
                                 GATE_DIM, SKIP_DIM, N_STAGE, KERNEL_SIZE,
                                 DILATION_RATE, N_UPSAMPLE_FACTOR)
    x = jax.random.normal(k_x, (B, INPUT_DIM, T), jnp.float32)

    out = decoder_forward_pallas(params, x)
    out = jax.block_until_ready(out)

    # Shape check: one upsample stage doubles T.
    assert out.shape == (B, OUTPUT_DIM, 2 * T), out.shape

    # Numerical check against an independent pure-JAX reference.
    ref = decoder_forward_ref(params, x)
    assert jnp.allclose(out, ref, atol=2e-3, rtol=2e-3), (
        float(jnp.max(jnp.abs(out - ref))))

    print("KERNEL_OK")
</pallas_src>

<mosaic_0001>
module attributes {stable_mosaic.version = 11 : i64} {
  func.func @kernel(%arg0: i32, %arg1: memref<1x16x16xf32, #tpu.memory_space<vmem>>, %arg2: memref<32x48xf32, #tpu.memory_space<vmem>>, %arg3: memref<32x1xf32, #tpu.memory_space<vmem>>, %arg4: memref<1x16x16xf32, #tpu.memory_space<vmem>>, %arg5: memref<16x18xf32, #tpu.memory_space<vmem>>, %arg6: memref<48x16xf32, #tpu.memory_space<vmem>>) attributes {dimension_semantics = [#tpu.dimension_semantics<parallel>], iteration_bounds = array<i64: 2>, scalar_prefetch = 0 : i64, scratch_operands = 2 : i64, tpu.core_type = #tpu.core_type<tc>, window_params = [{transform_indices = @transform_0, window_bounds = array<i64: 1, 16, 16>}, {pipeline_mode = #tpu.pipeline_mode<synchronous>, transform_indices = @transform_1, window_bounds = array<i64: 32, 48>}, {pipeline_mode = #tpu.pipeline_mode<synchronous>, transform_indices = @transform_2, window_bounds = array<i64: 32, 1>}, {transform_indices = @transform_3, window_bounds = array<i64: 1, 16, 16>}]} {
    %cst = arith.constant 0.000000e+00 : f32
    %0 = vector.broadcast %cst : f32 to vector<16x18xf32>
    %c0 = arith.constant 0 : index
    %c0_0 = arith.constant 0 : index
    %1 = vector.load %arg5[%c0, %c0_0] : memref<16x18xf32, #tpu.memory_space<vmem>>, vector<16x18xf32>
    tpu.vector_store %arg5[%c0, %c0_0], %0 {strides = array<i32>} : memref<16x18xf32, #tpu.memory_space<vmem>>, vector<16x18xf32>,
    %c0_1 = arith.constant 0 : index
    %c0_2 = arith.constant 0 : index
    %c0_3 = arith.constant 0 : index
    %2 = vector.load %arg1[%c0_1, %c0_2, %c0_3] : memref<1x16x16xf32, #tpu.memory_space<vmem>>, vector<1x16x16xf32>
    %3 = vector.shape_cast %2 : vector<1x16x16xf32> to vector<16x16xf32>
    %c0_4 = arith.constant 0 : index
    %c1 = arith.constant 1 : index
    %4 = vector.load %arg5[%c0_4, %c1] : memref<16x18xf32, #tpu.memory_space<vmem>>, vector<16x16xf32>
    tpu.vector_store %arg5[%c0_4, %c1], %3 {strides = array<i32>} : memref<16x18xf32, #tpu.memory_space<vmem>>, vector<16x16xf32>,
    %c0_5 = arith.constant 0 : index
    %c0_6 = arith.constant 0 : index
    %5 = vector.load %arg5[%c0_5, %c0_6] : memref<16x18xf32, #tpu.memory_space<vmem>>, vector<16x16xf32>
    %c0_7 = arith.constant 0 : index
    %c0_8 = arith.constant 0 : index
    %6 = vector.load %arg6[%c0_7, %c0_8] : memref<48x16xf32, #tpu.memory_space<vmem>>, vector<16x16xf32>
    tpu.vector_store %arg6[%c0_7, %c0_8], %5 {strides = array<i32>} : memref<48x16xf32, #tpu.memory_space<vmem>>, vector<16x16xf32>,
    %c0_9 = arith.constant 0 : index
    %c1_10 = arith.constant 1 : index
    %7 = vector.load %arg5[%c0_9, %c1_10] : memref<16x18xf32, #tpu.memory_space<vmem>>, vector<16x16xf32>
    %c16 = arith.constant 16 : index
    %c0_11 = arith.constant 0 : index
    %8 = vector.load %arg6[%c16, %c0_11] : memref<48x16xf32, #tpu.memory_space<vmem>>, vector<16x16xf32>
    tpu.vector_store %arg6[%c16, %c0_11], %7 {strides = array<i32>} : memref<48x16xf32, #tpu.memory_space<vmem>>, vector<16x16xf32>,
    %c0_12 = arith.constant 0 : index
    %c2 = arith.constant 2 : index
    %9 = vector.load %arg5[%c0_12, %c2] : memref<16x18xf32, #tpu.memory_space<vmem>>, vector<16x16xf32>
    %c32 = arith.constant 32 : index
    %c0_13 = arith.constant 0 : index
    %10 = vector.load %arg6[%c32, %c0_13] : memref<48x16xf32, #tpu.memory_space<vmem>>, vector<16x16xf32>
    tpu.vector_store %arg6[%c32, %c0_13], %9 {strides = array<i32>} : memref<48x16xf32, #tpu.memory_space<vmem>>, vector<16x16xf32>,
    %c0_14 = arith.constant 0 : index
    %c0_15 = arith.constant 0 : index
    %11 = vector.load %arg2[%c0_14, %c0_15] : memref<32x48xf32, #tpu.memory_space<vmem>>, vector<32x48xf32>
    %c0_16 = arith.constant 0 : index
    %c0_17 = arith.constant 0 : index
    %12 = vector.load %arg6[%c0_16, %c0_17] : memref<48x16xf32, #tpu.memory_space<vmem>>, vector<48x16xf32>
    %cst_18 = arith.constant dense<0.000000e+00> : vector<32x16xf32>
    %13 = tpu.matmul %11, %12, %cst_18 {dimension_numbers = #tpu.dot_dimension_numbers<[1], [0], [0], [1], [0, 0, 1, 1], [], []>} : vector<32x48xf32>, vector<48x16xf32>, vector<32x16xf32> -> vector<32x16xf32>
    %c0_19 = arith.constant 0 : index
    %c0_20 = arith.constant 0 : index
    %14 = vector.load %arg3[%c0_19, %c0_20] : memref<32x1xf32, #tpu.memory_space<vmem>>, vector<32x1xf32>
    %15 = vector.broadcast %14 : vector<32x1xf32> to vector<32x16xf32>
    %16 = arith.addf %13, %15 : vector<32x16xf32>
    %17 = vector.extract_strided_slice %16 {offsets = [0, 0], sizes = [16, 16], strides = [1, 1]} : vector<32x16xf32> to vector<16x16xf32>
    %18 = vector.extract_strided_slice %16 {offsets = [16, 0], sizes = [16, 16], strides = [1, 1]} : vector<32x16xf32> to vector<16x16xf32>
    %19 = arith.negf %18 : vector<16x16xf32>
    %20 = math.exp %19 : vector<16x16xf32>
    %cst_21 = arith.constant 1.000000e+00 : f32
    %21 = vector.broadcast %cst_21 : f32 to vector<16x16xf32>
    %22 = arith.addf %21, %20 : vector<16x16xf32>
    %23 = arith.divf %21, %22 : vector<16x16xf32>
    %24 = arith.mulf %17, %23 : vector<16x16xf32>
    %c0_22 = arith.constant 0 : index
    %c0_23 = arith.constant 0 : index
    %c0_24 = arith.constant 0 : index
    %25 = vector.load %arg4[%c0_22, %c0_23, %c0_24] : memref<1x16x16xf32, #tpu.memory_space<vmem>>, vector<1x16x16xf32>
    %26 = vector.shape_cast %25 : vector<1x16x16xf32> to vector<16x16xf32>
    %27 = vector.shape_cast %24 : vector<16x16xf32> to vector<1x16x16xf32>
    tpu.vector_store %arg4[%c0_22, %c0_23, %c0_24], %27 {strides = array<i32>} : memref<1x16x16xf32, #tpu.memory_space<vmem>>, vector<1x16x16xf32>,
    return
  }
  func.func @transform_0(%arg0: i32) -> (i32, i32, i32) {
    %c0_i32 = arith.constant 0 : i32
    %c0_i32_0 = arith.constant 0 : i32
    %c0_i32_1 = arith.constant 0 : i32
    return %arg0, %c0_i32, %c0_i32_0 : i32, i32, i32
  }
  func.func @transform_1(%arg0: i32) -> (i32, i32) {
    %c0_i32 = arith.constant 0 : i32
    %c0_i32_0 = arith.constant 0 : i32
    %c0_i32_1 = arith.constant 0 : i32
    return %c0_i32, %c0_i32_0 : i32, i32
  }
  func.func @transform_2(%arg0: i32) -> (i32, i32) {
    %c0_i32 = arith.constant 0 : i32
    %c0_i32_0 = arith.constant 0 : i32
    %c0_i32_1 = arith.constant 0 : i32
    return %c0_i32, %c0_i32_0 : i32, i32
  }
  func.func @transform_3(%arg0: i32) -> (i32, i32, i32) {
    %c0_i32 = arith.constant 0 : i32
    %c0_i32_0 = arith.constant 0 : i32
    %c0_i32_1 = arith.constant 0 : i32
    return %arg0, %c0_i32, %c0_i32_0 : i32, i32, i32
  }
}

</mosaic_0001>

<bundles_post_ra>
// kernel: tpu_custom_call.1
= control target key start
LH: loop header
LB: loop body
LE: loop exit
PB: predicated region body
PF: predicated region fallthrough
CT: control target
= control target key end

     0   :  { %8 = vsyncpa [#allocation5], 0  ;;  %s796_s0 = inlined_call_operand.vmem [shape: f32[2,16,16], index: 0, kind: input, shape index: {}]   ;;  %s797_s1 = inlined_call_operand.hbm [shape: f32[32,48], index: 1, kind: input, shape index: {}]   ;;  %s798_s2 = inlined_call_operand.vmem [shape: f32[32,1], index: 2, kind: input, shape index: {}]   ;;  %s799_s3 = inlined_call_operand.hbm [shape: f32[2,16,16], index: 3, kind: output, shape index: {}]  }
   0x1   :  { %9 = vsyncpa [#allocation6], 0 }
   0x2   :  { %11 = vsyncpa [#allocation6 + $0x1], 0  ;;  %s677_s12 = smov 0   ;;  %s679_s13 = smov 0  }
   0x3   :  { %s681_s14 = smov 0   ;;  %s683_s15 = smov 0  }
   0x4 LB: > { %s698_s16 = sadd.s32 4294967295, %s645_s15   ;;  %s439_s17 = sadd.s32 4294967294, %s645_s15   ;;  %s645_s15 = sphi %s683_s15, %s805_s15   ;;  %s641_s14 = sphi %s681_s14, %s804_s14   ;;  %s637_s13 = sphi %s679_s13, %s803_s13   ;;  %s633_s12 = sphi %s677_s12, %s802_s12  }
   0x5   : > { %s702_s18 = sadd.s32 1, %s645_s15   ;;  %s92_s19 = sadd.s32 1, %s641_s14 }
   0x6   : > { %s89_s20 = ssub.s32 %s645_s15, %s702_s18  ;;  %p102_p0 = scmp.ne.s32.totalorder %s641_s14, %s637_s13 }
   0x7   : > { %p90_p1 = scmp.eq.s32.totalorder %s89_s20, 0  ;;  %p103_p2 = scmp.eq.s32.totalorder %s698_s16, 1 }
   0x8   : > { %p108_p3 = scmp.ne.s32.totalorder %s637_s13, %s633_s12  ;;  %p109_p4 = scmp.eq.s32.totalorder %s439_s17, 1 }
   0x9   : > { %s713_s21 = scalar_select %p90_p1, %s641_s14, %s92_s19  }
   0xa   : > { %p715_p5 = por %p103_p2, %p102_p0  ;;  %p719_p6 = por %p109_p4, %p108_p3 }
   0xb   : > { %p440_p7 = scmp.ge.s32.totalorder %s645_s15, 1  ;;  %p116_p8 = scmp.lt.s32.totalorder %s645_s15, 3 }
   0xc   : > { %p493_p9 = scmp.eq.s32.totalorder %s698_s16, 0  ;;  %s127_s26 = sshll.u32 %s797_s1, 4  ;;  %s128_s26 = int_to_ptr.hbm [resolvable:$true] %s127_s26 }
   0xd   : > { %p117_p10 = pnand %p440_p7, %p116_p8  ;;  %s647_s27 = smov [#allocation4]  }
   0xe   : > { %s129_s28 = sshll.u32 %s647_s27, 4  ;;  %s648_s29 = smov 128   ;;  %s130_s28 = int_to_ptr.vmem [resolvable:$true] %s129_s28 }
   0xf   : > { %p485_p11 = pneg %p117_p10  ;;  %s649_s30 = smov 8  }
  0x10   : > { %156 = sbr.rel (%p117_p10) target bundleno = 462 (0x1ce), region = 32 }
  0x11   : > { %p486_p12 = pnand %p493_p9, %p485_p11 }
  0x13   : > { %488 = dma.hbm_to_vmem [thread:$0]  (!%p486_p12), %s128_s26, 512, %s130_s28, [#allocation5], %s648_s29, %s648_s29, %s649_s30  }
  0x15   : > { %624 = dma.done.wait (%p493_p9), [#allocation5], 512  }
  0x16   : > { %626 = vsyncadd (%p493_p9), [#allocation5], 4294966784  ;;  %p181_p13 = scmp.lt.s32.totalorder %s698_s16, 1  ;;  %vm186_vm0 = vcmask 146432   ;;  %v650_v0 = vmov 0.0   ;;  %s651_s9 = smov 1  }
  0x17   : > { %188 = vst.msk [vmem:[#allocation2 + $0x8] sm:$0xff] %vm186_vm0, %v650_v0  ;;  %vm199_vm1 = vcmask 138248   ;;  %vm204_vm2 = vcmask 130048   ;;  %s652_s10 = smov 126   ;;  %s653_s11 = smov 127   ;;  %v244_v9 = vld [vmem:[%s798_s2 + $0x18] sm:$0xff] }
  0x18   : > { %s182_s4 = scalar_select %p181_p13, %s698_s16, 1  ;;  %187 = vst.msk [vmem:[#allocation2] sm:$0xff] %vm186_vm0, %v650_v0  ;;  %v243_v10 = vld [vmem:[%s798_s2 + $0x10] sm:$0xff]  ;;  %v654_v11 = vmov 0   ;;  %v241_v12 = vld [vmem:[%s798_s2] sm:$0xff]  ;;  %v242_v14 = vld [vmem:[%s798_s2 + $0x8] sm:$0xff] }
  0x19   : > { %539 = vset.pattern.permute.xlu1 %v654_v11  ;;  %538 = vset.pattern.permute.xlu0 %v654_v11  ;;  %v233_v22 = vld [vmem:[#allocation4 + $0x10] sm:$0xff]  ;;  %vm265_vm3 = vcmask 392192   ;;  %v234_v23 = vld [vmem:[#allocation4 + $0x18] sm:$0xff]  ;;  %v232_v24 = vld [vmem:[#allocation4 + $0x8] sm:$0xff]  ;;  %s178_s29 = sand.u32 1, %s637_s13   ;;  %s599_s24 = scalar_lea.hbm %s799_s3, 32 }
  0x1a   : > { %s459_s5 = sshll.u32 %s182_s4, 4  ;;  %540 = vset.pattern.permute.xlu2 %v654_v11  ;;  %v231_v25 = vld [vmem:[#allocation4] sm:$0xff]  ;;  %s445_s30 = sshll.u32 %s178_s29, 4 }
  0x1b   : > { %s185_s8 = scalar_lea.vmem %s796_s0, %s459_s5  ;;  %s460_s4 = sshll.u32 %s698_s16, 4 }
  0x1c   : > { %v190_v1 = vld [vmem:[%s185_s8 + $0x8] sm:$0xff]  ;;  %v189_v2 = vld [vmem:[%s185_s8] sm:$0xff]  ;;  %s361_s7 = scalar_lea.hbm %s799_s3, %s460_s4  ;;  %s180_s16 = scalar_lea.vmem [#allocation7], %s445_s30 }
  0x1d   : > { %195 = vrot.lane.b32.xlu0 %v190_v1, %s651_s9  ;;  %s362_s8 = sshll.u32 %s180_s16, 4  ;;  %s363_s8 = int_to_ptr.vmem [resolvable:$true] %s362_s8 }
  0x25   : > { %193 = vrot.lane.b32.xlu0 %v189_v2, %s651_s9  ;;  %s364_s9 = sshll.u32 %s361_s7, 4  ;;  %s365_s9 = int_to_ptr.hbm [resolvable:$true] %s364_s9 }
  0x2d   : > { %257 = vperm.xlu0 %538, %v243_v10  }
  0x8f   : > { %v196_v3 = vpop.permute.xlu0 %195 }
  0x90   : > { %201 = vst.msk [vmem:[#allocation2 + $0x8] sm:$0xff] %vm199_vm1, %v196_v3 }
  0x97   : > { %v203_v4 = vld [vmem:[#allocation2 + $0x8] sm:$0xff]  ;;  %v194_v5 = vpop.permute.xlu0 %193 }
  0x98   : > { %200 = vst.msk [vmem:[#allocation2] sm:$0xff] %vm199_vm1, %v194_v5  ;;  %225 = vrot.lane.b32.xlu1 %v203_v4, %s652_s10  ;;  %213 = vrot.lane.b32.xlu2 %v203_v4, %s653_s11 }
  0x99   : > { %206 = vst.msk [vmem:[#allocation3 + $0x8] sm:$0xff] %vm204_vm2, %v203_v4 }
  0x9f   : > { %v202_v6 = vld [vmem:[#allocation2] sm:$0xff]  ;;  %v258_v26 = vpop.permute.xlu0 %257 }
  0xa0   : > { %223 = vrot.lane.b32.xlu1 %v202_v6, %s652_s10  ;;  %211 = vrot.lane.b32.xlu2 %v202_v6, %s653_s11  ;;  %205 = vst.msk [vmem:[#allocation3] sm:$0xff] %vm204_vm2, %v202_v6  ;;  %v236_v20 = vld [vmem:[#allocation3 + $0x8] sm:$0xff]  ;;  %s350_s10 = scalar_lea.sflag [#allocation6], %s178_s29  ;;  %s593_s11 = sshra.s32 %s365_s9, 4  ;;  %s594_s11 = int_to_ptr.hbm [resolvable:$true] %s593_s11 }
  0xa1   : > { %s595_s17 = scalar_lea.hbm %s594_s11, 16  ;;  %p600_p3 = scmp.lt.s32.totalorder %s594_s11, %s799_s3 }
  0xa2   : > { %p596_p0 = scmp.ne.s32.totalorder %s594_s11, %s595_s17  ;;  %p601_p4 = scmp.lt.s32.totalorder %s599_s24, %s595_s17 }
  0xa4   : > { %p597_p1 = pnand %p596_p0, %p715_p5  ;;  %p602_p7 = por %p601_p4, %p600_p3 }
  0xa6   : > { %p598_p2 = pneg %p597_p1 }
  0xa7   : > { %v235_v21 = vld [vmem:[#allocation3] sm:$0xff] }
  0xa8   : > { %262 = vperm.xlu1 %539, %v244_v9   ;;  %247 = vperm.xlu2 %540, %v241_v12   ;;  %p603_p8 = pnand %p602_p7, %p598_p2 }
  0xb0   : > { %252 = vperm.xlu1 %539, %v242_v14  }
  0xf2   : > { %v214_v7 = vpop.permute.xlu2 %213 }
  0xf3   : > { %218 = vst.msk [vmem:[#allocation3 + $0x18] sm:$0xff] %vm204_vm2, %v214_v7 }
  0xfa   : > { %v212_v8 = vpop.permute.xlu2 %211  ;;  %v238_v18 = vld [vmem:[#allocation3 + $0x18] sm:$0xff] }
  0xfb   : > { %217 = vst.msk [vmem:[#allocation3 + $0x10] sm:$0xff] %vm204_vm2, %v212_v8 }
 0x102   : > { %v237_v19 = vld [vmem:[#allocation3 + $0x10] sm:$0xff]  ;;  %v248_v44 = vpop.permute.xlu2 %247 }
 0x10a   : > { %v226_v13 = vpop.permute.xlu1 %225 }
 0x10b   : > { %230 = vst.msk [vmem:[#allocation3 + $0x28] sm:$0xff] %vm204_vm2, %v226_v13 }
 0x112   : > { %v224_v15 = vpop.permute.xlu1 %223  ;;  %v240_v16 = vld [vmem:[#allocation3 + $0x28] sm:$0xff] }
 0x113   : > { %229 = vst.msk [vmem:[#allocation3 + $0x20] sm:$0xff] %vm204_vm2, %v224_v15  ;;  %288 = vmatpush.msra.mxu0 %v240_v16  ;;  %461 = vmatpush.msra.mxu1 %v240_v16 }
 0x114   : > { %462 = vmatpush.msra.mxu2 %v240_v16  ;;  %463 = vmatpush.msra.mxu3 %v240_v16 }
 0x11a   : > { %v239_v17 = vld [vmem:[#allocation3 + $0x20] sm:$0xff]  ;;  %v263_v27 = vpop.permute.xlu1 %262 }
 0x11b   : > { %289 = vmatpush.msra.mxu0 %v239_v17  ;;  %464 = vmatpush.msra.mxu1 %v239_v17 }
 0x11c   : > { %465 = vmatpush.msra.mxu2 %v239_v17  ;;  %466 = vmatpush.msra.mxu3 %v239_v17 }
 0x11d   : > { %290 = vmatpush.msra.mxu0 %v238_v18  ;;  %467 = vmatpush.msra.mxu1 %v238_v18 }
 0x11e   : > { %468 = vmatpush.msra.mxu2 %v238_v18  ;;  %469 = vmatpush.msra.mxu3 %v238_v18 }
 0x11f   : > { %291 = vmatpush.msra.mxu0 %v237_v19  ;;  %470 = vmatpush.msra.mxu1 %v237_v19 }
 0x120   : > { %471 = vmatpush.msra.mxu2 %v237_v19  ;;  %472 = vmatpush.msra.mxu3 %v237_v19 }
 0x121   : > { %292 = vmatpush.msra.mxu0 %v236_v20  ;;  %473 = vmatpush.msra.mxu1 %v236_v20 }
 0x122   : > { %474 = vmatpush.msra.mxu2 %v236_v20  ;;  %475 = vmatpush.msra.mxu3 %v236_v20  ;;  %v253_v52 = vpop.permute.xlu1 %252 }
 0x123   : > { %293 = vmatpush.msra.mxu0 %v235_v21  ;;  %476 = vmatpush.msra.mxu1 %v235_v21 }
 0x124   : > { %477 = vmatpush.msra.mxu2 %v235_v21  ;;  %478 = vmatpush.msra.mxu3 %v235_v21 }
 0x125   : > { %450 = vmatmul.msk.f32.vlgmr.msra.gmra.mxu2 %vm265_vm3, %v233_v22  ;;  %451 = vmatmul.msk.f32.vlgmr.msra.gmra.mxu3 %vm265_vm3, %v234_v23 }
 0x126   : > { %449 = vmatmul.msk.f32.vlgmr.msra.gmra.mxu1 %vm265_vm3, %v232_v24  ;;  %448 = vmatmul.msk.f32.vlgmr.msra.gmra.mxu0 %vm265_vm3, %v231_v25 }
 0x1a3   : > { %v295_v45 = vpop.f32.mrf.mxu0  ;;  %v298_v53 = vpop.f32.mrf.mxu1 }
 0x1a4   : > { %v296_v54 = vadd.f32 %v295_v45, %v248_v44  ;;  %v299_v60 = vadd.f32 %v298_v53, %v253_v52 }
 0x1a8   : > { %v301_v28 = vpop.f32.mrf.mxu2  ;;  %v304_v29 = vpop.f32.mrf.mxu3 }
 0x1a9   : > { %v302_v30 = vadd.f32 %v301_v28, %v258_v26  ;;  %v305_v31 = vadd.f32 %v304_v29, %v263_v27 }
 0x1ab   : > { %v452_v32 = vmul.f32 -1.442695, %v302_v30  ;;  %v453_v33 = vmul.f32 -1.442695, %v305_v31 }
 0x1ad   : > { %541 = vpow2.f32 %v452_v32 }
 0x1ae   : > { %543 = vpow2.f32 %v453_v33 }
 0x1b3   : > { %v542_v34 = vpop.eup %541 }
 0x1b4   : > { %v544_v35 = vpop.eup %543  ;;  %v313_v36 = vadd.f32 1.0, %v542_v34 }
 0x1b5   : > { %v314_v37 = vadd.f32 1.0, %v544_v35 }
 0x1b6   : > { %545 = vrcp.f32 %v313_v36  ;;  %v326_v46 = vand.u32 2147483648, %v313_v36  ;;  %v324_v49 = vand.u32 2147483647, %v313_v36  ;;  %vm320_vm6 = vweird.f32 %v313_v36 }
 0x1b7   : > { %547 = vrcp.f32 %v314_v37  ;;  %v341_v47 = vand.u32 2147483648, %v314_v37  ;;  %v339_v51 = vand.u32 2147483647, %v314_v37  ;;  %vm335_vm7 = vweird.f32 %v314_v37 }
 0x1b8   : > { %v327_v57 = vor.u32 1.1754944e-38, %v326_v46  ;;  %vm325_vm10 = vcmp.eq.f32.partialorder %v324_v49, 8.507059e+37 }
 0x1b9   : > { %v342_v58 = vor.u32 1.1754944e-38, %v341_v47  ;;  %vm340_vm11 = vcmp.eq.f32.partialorder %v339_v51, 8.507059e+37 }
 0x1bc   : > { %v546_v38 = vpop.eup %545 }
 0x1bd   : > { %v548_v39 = vpop.eup %547  ;;  %v316_v40 = vmul.f32 %v546_v38, %v313_v36  ;;  %vm321_vm4 = vweird.f32 %v546_v38 }
 0x1be   : > { %v331_v41 = vmul.f32 %v548_v39, %v314_v37  ;;  %vm336_vm5 = vweird.f32 %v548_v39  ;;  %vm322_vm8 = vmor %vm320_vm6, %vm321_vm4 }
 0x1bf   : > { %v317_v42 = vsub.f32 1.0, %v316_v40  ;;  %vm337_vm9 = vmor %vm335_vm7, %vm336_vm5 }
 0x1c0   : > { %v332_v43 = vsub.f32 1.0, %v331_v41 }
 0x1c1   : > { %v318_v48 = vmul.f32 %v546_v38, %v317_v42 }
 0x1c2   : > { %v333_v50 = vmul.f32 %v548_v39, %v332_v43 }
 0x1c3   : > { %v319_v55 = vadd.f32 %v546_v38, %v318_v48 }
 0x1c4   : > { %v334_v56 = vadd.f32 %v548_v39, %v333_v50 }
 0x1c5   : > { %v323_v59 = vsel %vm322_vm8, %v546_v38, %v319_v55 }
 0x1c6   : > { %v338_v61 = vsel %vm337_vm9, %v548_v39, %v334_v56  ;;  %v328_v62 = vsel %vm325_vm10, %v327_v57, %v323_v59 }
 0x1c7   : > { %v343_v63 = vsel %vm340_vm11, %v342_v58, %v338_v61  ;;  %v345_v0 = vmul.f32 %v328_v62, %v296_v54 }
 0x1c8   : > { %v346_v1 = vmul.f32 %v343_v63, %v299_v60 }
 0x1c9   : > { %347 = vst.msk [vmem:[%s180_s16] sm:$0xff] %vm204_vm2, %v345_v0 }
 0x1ca   : > { %348 = vst.msk [vmem:[%s180_s16 + $0x8] sm:$0xff] %vm204_vm2, %v346_v1 }
 0x1cb   : > { %606 = shalt.err (!%p603_p8)
}
 0x1cc   : > { %s655_s27 = smov 128   ;;  %s656_s28 = smov 8  }
 0x1cd   : > { %483 = dma.vmem_to_hbm [thread:$0]  (%p715_p5), %s363_s8, 256, %s365_s9, %s350_s10, %s655_s27, %s655_s27, %s656_s28  }
 0x1ce PF: > { %p495_p9 = scmp.ge.s32.totalorder %s645_s15, 2  ;;  %s379_s29 = sand.u32 1, %s633_s12  }
 0x1cf   : > { %s380_s30 = scalar_lea.sflag [#allocation6], %s379_s29 }
 0x1d0   : > { %p490_p10 = pnand %p495_p9, %p719_p6 }
 0x1d2   : > { %p491_p11 = pneg %p490_p10 }
 0x1d4   : > { %628 = dma.done.wait (%p491_p11), %s380_s30, 256  }
 0x1d5   : > { %630 = vsyncadd (%p491_p11), %s380_s30, 4294967040  ;;  %p14_p12 = scmp.ge.s32.totalorder %s702_s18, 4   ;;  %s802_s12 = smov %s637_s13 }
 0x1d6   : > { %s803_s13 = smov %s641_s14  ;;  %s804_s14 = smov %s713_s21 }
 0x1d7   : > { %s805_s15 = smov %s702_s18  ;;  %16 = sbr.rel (!%p14_p12) target bundleno = 4 (0x4), region = 72 }
 0x1dc   :  { %386 = vsyncpa [#allocation5], 1 }
 0x1dd   :  { %388 = vsyncpa [#allocation5 + $0x1], 1 }
 0x1de   :  { %389 = vsyncpa [#allocation6], 1 }
 0x1df   :  { %391 = vsyncpa [#allocation6 + $0x1], 1 }

</bundles_post_ra>
